<compile_context>
chip_gen: v6e
topology: v6e:2x2x1
jax: 0.10.0
libtpu: 0.0.40
codegen_flags: <defaults>
</compile_context>

<pallas_src>
import jax
import jax.numpy as jnp
from jax.experimental import pallas as pl
from jax.experimental.pallas import tpu as pltpu

LANE = 128  # TPU lane width; hidden/action dims are zero-padded up to this for the MXU


def _round_up(x, m):
    return ((x + m - 1) // m) * m


def dqn_kernel(x_ref, w1_ref, b1_ref, w2_ref, b2_ref, w3_ref, b3_ref, out_ref):
    # fc1: cast x to the MXU operand dtype in-kernel (no wrapper cast / extra HBM pass),
    # f32 accumulation; bias + ReLU in f32 on the VPU.
    h = jnp.dot(x_ref[...].astype(w1_ref.dtype), w1_ref[...],
                preferred_element_type=jnp.float32)
    h = jnp.maximum(h + b1_ref[...], 0.0)
    # fc2
    h = jnp.dot(h.astype(w2_ref.dtype), w2_ref[...],
                preferred_element_type=jnp.float32)
    h = jnp.maximum(h + b2_ref[...], 0.0)
    # output layer (no activation); padded columns are exact zeros.
    q = jnp.dot(h.astype(w3_ref.dtype), w3_ref[...],
                preferred_element_type=jnp.float32)
    q = q + b3_ref[...]
    # Store only the real action columns -- the HBM output array is (B, action_size),
    # so no padded lanes ever hit HBM.
    out_ref[...] = q[:, :out_ref.shape[1]].astype(out_ref.dtype)


def prepare_params(params, *, use_bf16=True):
    """One-time padding + MXU-dtype cast of the weights (hoisted out of the hot path)."""
    w1, b1, w2, b2, w3, b3 = (params[k] for k in ("w1", "b1", "w2", "b2", "w3", "b3"))
    S, H = w1.shape
    A = w3.shape[1]
    Hp = _round_up(H, LANE)            # 64 -> 128
    Ap = _round_up(A, LANE)            # action_size -> 128
    mxu = jnp.bfloat16 if use_bf16 else jnp.float32

    w1p = jnp.zeros((S, Hp), mxu).at[:, :H].set(w1.astype(mxu))
    w2p = jnp.zeros((Hp, Hp), mxu).at[:H, :H].set(w2.astype(mxu))
    w3p = jnp.zeros((Hp, Ap), mxu).at[:H, :A].set(w3.astype(mxu))
    # biases (and the bias-add/ReLU epilogue) stay f32
    b1p = jnp.zeros((1, Hp), jnp.float32).at[:, :H].set(b1)
    b2p = jnp.zeros((1, Hp), jnp.float32).at[:, :H].set(b2)
    b3p = jnp.zeros((1, Ap), jnp.float32).at[:, :A].set(b3)
    return {"w1": w1p, "b1": b1p, "w2": w2p, "b2": b2p, "w3": w3p, "b3": b3p,
            "action_size": A}


def _batch_tile(B, block_b):
    """Batch tile: big enough to amortize per-step overhead, multiple of 16 (bf16
    sublane packing), and >= 2 grid steps for large B so v7x's 2 TCs both get work."""
    tb = min(block_b, B)
    if B >= 1024 and pl.cdiv(B, tb) < 2:
        tb = pl.cdiv(B, 2)
    m = 16 if tb >= 16 else 8
    return _round_up(tb, m)


def dqn_forward(x, prepared, *, block_b=2048):
    """x: [B, state_size] f32. prepared: output of prepare_params()."""
    w1p, b1p, w2p, b2p, w3p, b3p = (prepared[k] for k in
                                    ("w1", "b1", "w2", "b2", "w3", "b3"))
    A = prepared["action_size"]
    B, S = x.shape
    Hp = w1p.shape[1]
    Ap = w3p.shape[1]

    tb = _batch_tile(B, block_b)
    grid = (pl.cdiv(B, tb),)           # ragged last block handled by Pallas (OOB
                                       # input rows are ignored, OOB output rows dropped)

    # Constant index_map -> block stays VMEM-resident; Pallas elides the re-DMA.
    resident = lambda a: pl.BlockSpec(a.shape, lambda i, _n=a.ndim: (0,) * _n)

    flops = 2 * B * (S * Hp + Hp * Hp + Hp * Ap)
    bytes_accessed = (x.size * x.dtype.itemsize
                      + sum(int(a.size) * a.dtype.itemsize
                            for a in (w1p, b1p, w2p, b2p, w3p, b3p))
                      + B * A * 4)

    return pl.pallas_call(
        dqn_kernel,
        out_shape=jax.ShapeDtypeStruct((B, A), jnp.float32),
        grid=grid,
        in_specs=[pl.BlockSpec((tb, S), lambda i: (i, 0)),   # S not padded: HBM-bound
                  resident(w1p), resident(b1p),
                  resident(w2p), resident(b2p),
                  resident(w3p), resident(b3p)],
        out_specs=pl.BlockSpec((tb, A), lambda i: (i, 0)),   # lane dim == full action dim
        compiler_params=pltpu.CompilerParams(
            dimension_semantics=("parallel",)),
        cost_estimate=pl.CostEstimate(flops=flops, transcendentals=0,
                                      bytes_accessed=bytes_accessed),
    )(x, w1p, b1p, w2p, b2p, w3p, b3p)


def init_params(key, state_size, action_size, hidden=64):
    # Deterministic synthetic init (uniform, like PyTorch's default Linear init).
    ks = jax.random.split(key, 6)

    def lin(kw, kb, fan_in, fan_out):
        bound = 1.0 / jnp.sqrt(fan_in)
        w = jax.random.uniform(kw, (fan_in, fan_out), jnp.float32, -bound, bound)
        b = jax.random.uniform(kb, (1, fan_out), jnp.float32, -bound, bound)
        return w, b

    w1, b1 = lin(ks[0], ks[1], state_size, hidden)
    w2, b2 = lin(ks[2], ks[3], hidden, hidden)
    w3, b3 = lin(ks[4], ks[5], hidden, action_size)
    return {"w1": w1, "b1": b1, "w2": w2, "b2": b2, "w3": w3, "b3": b3}


def reference_forward(x, p):
    h1 = jnp.maximum(x @ p["w1"] + p["b1"], 0.0)
    h2 = jnp.maximum(h1 @ p["w2"] + p["b2"], 0.0)
    return h2 @ p["w3"] + p["b3"]


if __name__ == "__main__":
    key = jax.random.PRNGKey(0)
    k_param, k_x = jax.random.split(key)

    batch, state_size, action_size = 8, 16, 8
    params = init_params(k_param, state_size, action_size)
    x = jax.random.normal(k_x, (batch, state_size), jnp.float32)

    # One-time parameter prep (padding + bf16 cast) hoisted out of the forward path.
    prepared_bf16 = prepare_params(params, use_bf16=True)
    prepared_f32 = prepare_params(params, use_bf16=False)

    out = jax.block_until_ready(dqn_forward(x, prepared_bf16))
    ref = reference_forward(x, params)

    assert out.shape == (batch, action_size)
    # bf16 MXU operands (f32 accumulation) -> bf16-appropriate tolerance vs f32 ref.
    assert jnp.allclose(out, ref, atol=5e-2, rtol=5e-2), float(jnp.max(jnp.abs(out - ref)))
    # Exactness sanity check of the padding/tiling/store path itself (f32 operands).
    out_f32 = jax.block_until_ready(dqn_forward(x, prepared_f32))
    assert jnp.allclose(out_f32, ref, atol=1e-5, rtol=1e-5)
    print("KERNEL_OK")
</pallas_src>

<mosaic_0001>
module attributes {stable_mosaic.version = 11 : i64} {
  func.func @dqn_kernel(%arg0: i32, %arg1: memref<8x16xf32, #tpu.memory_space<vmem>>, %arg2: memref<16x128xbf16, #tpu.memory_space<vmem>>, %arg3: memref<1x128xf32, #tpu.memory_space<vmem>>, %arg4: memref<128x128xbf16, #tpu.memory_space<vmem>>, %arg5: memref<1x128xf32, #tpu.memory_space<vmem>>, %arg6: memref<128x128xbf16, #tpu.memory_space<vmem>>, %arg7: memref<1x128xf32, #tpu.memory_space<vmem>>, %arg8: memref<8x8xf32, #tpu.memory_space<vmem>>) attributes {dimension_semantics = [#tpu.dimension_semantics<parallel>], iteration_bounds = array<i64: 1>, scalar_prefetch = 0 : i64, scratch_operands = 0 : i64, tpu.core_type = #tpu.core_type<tc>, window_params = [{transform_indices = @transform_0, window_bounds = array<i64: 8, 16>}, {pipeline_mode = #tpu.pipeline_mode<synchronous>, transform_indices = @transform_1, window_bounds = array<i64: 16, 128>}, {pipeline_mode = #tpu.pipeline_mode<synchronous>, transform_indices = @transform_2, window_bounds = array<i64: 1, 128>}, {pipeline_mode = #tpu.pipeline_mode<synchronous>, transform_indices = @transform_3, window_bounds = array<i64: 128, 128>}, {pipeline_mode = #tpu.pipeline_mode<synchronous>, transform_indices = @transform_4, window_bounds = array<i64: 1, 128>}, {pipeline_mode = #tpu.pipeline_mode<synchronous>, transform_indices = @transform_5, window_bounds = array<i64: 128, 128>}, {pipeline_mode = #tpu.pipeline_mode<synchronous>, transform_indices = @transform_6, window_bounds = array<i64: 1, 128>}, {transform_indices = @transform_7, window_bounds = array<i64: 8, 8>}]} {
    %c0 = arith.constant 0 : index
    %c0_0 = arith.constant 0 : index
    %0 = vector.load %arg1[%c0, %c0_0] : memref<8x16xf32, #tpu.memory_space<vmem>>, vector<8x16xf32>
    %1 = arith.truncf %0 : vector<8x16xf32> to vector<8x16xbf16>
    %c0_1 = arith.constant 0 : index
    %c0_2 = arith.constant 0 : index
    %2 = vector.load %arg2[%c0_1, %c0_2] : memref<16x128xbf16, #tpu.memory_space<vmem>>, vector<16x128xbf16>
    %cst = arith.constant dense<0.000000e+00> : vector<8x128xf32>
    %3 = tpu.matmul %1, %2, %cst {dimension_numbers = #tpu.dot_dimension_numbers<[1], [0], [0], [1], [0, 0, 1, 1], [], []>} : vector<8x16xbf16>, vector<16x128xbf16>, vector<8x128xf32> -> vector<8x128xf32>
    %c0_3 = arith.constant 0 : index
    %c0_4 = arith.constant 0 : index
    %4 = vector.load %arg3[%c0_3, %c0_4] : memref<1x128xf32, #tpu.memory_space<vmem>>, vector<1x128xf32>
    %5 = vector.broadcast %4 : vector<1x128xf32> to vector<8x128xf32>
    %6 = arith.addf %3, %5 : vector<8x128xf32>
    %cst_5 = arith.constant 0.000000e+00 : f32
    %7 = vector.broadcast %cst_5 : f32 to vector<8x128xf32>
    %8 = arith.maximumf %6, %7 : vector<8x128xf32>
    %9 = arith.truncf %8 : vector<8x128xf32> to vector<8x128xbf16>
    %c0_6 = arith.constant 0 : index
    %c0_7 = arith.constant 0 : index
    %10 = vector.load %arg4[%c0_6, %c0_7] : memref<128x128xbf16, #tpu.memory_space<vmem>>, vector<128x128xbf16>
    %cst_8 = arith.constant dense<0.000000e+00> : vector<8x128xf32>
    %11 = tpu.matmul %9, %10, %cst_8 {dimension_numbers = #tpu.dot_dimension_numbers<[1], [0], [0], [1], [0, 0, 1, 1], [], []>} : vector<8x128xbf16>, vector<128x128xbf16>, vector<8x128xf32> -> vector<8x128xf32>
    %c0_9 = arith.constant 0 : index
    %c0_10 = arith.constant 0 : index
    %12 = vector.load %arg5[%c0_9, %c0_10] : memref<1x128xf32, #tpu.memory_space<vmem>>, vector<1x128xf32>
    %13 = vector.broadcast %12 : vector<1x128xf32> to vector<8x128xf32>
    %14 = arith.addf %11, %13 : vector<8x128xf32>
    %cst_11 = arith.constant 0.000000e+00 : f32
    %15 = vector.broadcast %cst_11 : f32 to vector<8x128xf32>
    %16 = arith.maximumf %14, %15 : vector<8x128xf32>
    %17 = arith.truncf %16 : vector<8x128xf32> to vector<8x128xbf16>
    %c0_12 = arith.constant 0 : index
    %c0_13 = arith.constant 0 : index
    %18 = vector.load %arg6[%c0_12, %c0_13] : memref<128x128xbf16, #tpu.memory_space<vmem>>, vector<128x128xbf16>
    %cst_14 = arith.constant dense<0.000000e+00> : vector<8x128xf32>
    %19 = tpu.matmul %17, %18, %cst_14 {dimension_numbers = #tpu.dot_dimension_numbers<[1], [0], [0], [1], [0, 0, 1, 1], [], []>} : vector<8x128xbf16>, vector<128x128xbf16>, vector<8x128xf32> -> vector<8x128xf32>
    %c0_15 = arith.constant 0 : index
    %c0_16 = arith.constant 0 : index
    %20 = vector.load %arg7[%c0_15, %c0_16] : memref<1x128xf32, #tpu.memory_space<vmem>>, vector<1x128xf32>
    %21 = vector.broadcast %20 : vector<1x128xf32> to vector<8x128xf32>
    %22 = arith.addf %19, %21 : vector<8x128xf32>
    %23 = vector.extract_strided_slice %22 {offsets = [0, 0], sizes = [8, 8], strides = [1, 1]} : vector<8x128xf32> to vector<8x8xf32>
    %c0_17 = arith.constant 0 : index
    %c0_18 = arith.constant 0 : index
    %24 = vector.load %arg8[%c0_17, %c0_18] : memref<8x8xf32, #tpu.memory_space<vmem>>, vector<8x8xf32>
    tpu.vector_store %arg8[%c0_17, %c0_18], %23 {strides = array<i32>} : memref<8x8xf32, #tpu.memory_space<vmem>>, vector<8x8xf32>,
    return
  }
  func.func @transform_0(%arg0: i32) -> (i32, i32) {
    %c0_i32 = arith.constant 0 : i32
    %c0_i32_0 = arith.constant 0 : i32
    return %arg0, %c0_i32 : i32, i32
  }
  func.func @transform_1(%arg0: i32) -> (i32, i32) {
    %c0_i32 = arith.constant 0 : i32
    %c0_i32_0 = arith.constant 0 : i32
    %c0_i32_1 = arith.constant 0 : i32
    return %c0_i32, %c0_i32_0 : i32, i32
  }
  func.func @transform_2(%arg0: i32) -> (i32, i32) {
    %c0_i32 = arith.constant 0 : i32
    %c0_i32_0 = arith.constant 0 : i32
    %c0_i32_1 = arith.constant 0 : i32
    return %c0_i32, %c0_i32_0 : i32, i32
  }
  func.func @transform_3(%arg0: i32) -> (i32, i32) {
    %c0_i32 = arith.constant 0 : i32
    %c0_i32_0 = arith.constant 0 : i32
    %c0_i32_1 = arith.constant 0 : i32
    return %c0_i32, %c0_i32_0 : i32, i32
  }
  func.func @transform_4(%arg0: i32) -> (i32, i32) {
    %c0_i32 = arith.constant 0 : i32
    %c0_i32_0 = arith.constant 0 : i32
    %c0_i32_1 = arith.constant 0 : i32
    return %c0_i32, %c0_i32_0 : i32, i32
  }
  func.func @transform_5(%arg0: i32) -> (i32, i32) {
    %c0_i32 = arith.constant 0 : i32
    %c0_i32_0 = arith.constant 0 : i32
    %c0_i32_1 = arith.constant 0 : i32
    return %c0_i32, %c0_i32_0 : i32, i32
  }
  func.func @transform_6(%arg0: i32) -> (i32, i32) {
    %c0_i32 = arith.constant 0 : i32
    %c0_i32_0 = arith.constant 0 : i32
    %c0_i32_1 = arith.constant 0 : i32
    return %c0_i32, %c0_i32_0 : i32, i32
  }
  func.func @transform_7(%arg0: i32) -> (i32, i32) {
    %c0_i32 = arith.constant 0 : i32
    %c0_i32_0 = arith.constant 0 : i32
    return %arg0, %c0_i32 : i32, i32
  }
}

</mosaic_0001>

<bundles_post_ra>
// kernel: tpu_custom_call.1
= control target key start
LH: loop header
LB: loop body
LE: loop exit
PB: predicated region body
PF: predicated region fallthrough
CT: control target
= control target key end

     0   :  { %12 = vsyncpa [#allocation3], 0  ;;  %s710_s0 = inlined_call_operand.hbm [shape: f32[8,16], index: 0, kind: input, shape index: {}]   ;;  %s711_s1 = inlined_call_operand.hbm [shape: bf16[16,128], index: 1, kind: input, shape index: {}]   ;;  %s712_s2 = inlined_call_operand.vmem [shape: f32[1,128], index: 2, kind: input, shape index: {}]   ;;  %s713_s3 = inlined_call_operand.hbm [shape: bf16[128,128], index: 3, kind: input, shape index: {}]   ;;  %s714_s4 = inlined_call_operand.vmem [shape: f32[1,128], index: 4, kind: input, shape index: {}]   ;;  %s715_s5 = inlined_call_operand.hbm [shape: bf16[128,128], index: 5, kind: input, shape index: {}]   ;;  %s716_s6 = inlined_call_operand.vmem [shape: f32[1,128], index: 6, kind: input, shape index: {}]   ;;  %s717_s7 = inlined_call_operand.hbm [shape: f32[8,8], index: 7, kind: output, shape index: {}]  }
   0x1   :  { %13 = vsyncpa [#allocation6], 0 }
   0x2   :  { %14 = vsyncpa [#allocation9], 0 }
   0x3   :  { %15 = vsyncpa [#allocation4], 0  ;;  %s608_s24 = smov [#allocation5]  }
   0x4   :  { %s31_s25 = sshll.u32 %s608_s24, 4  ;;  %s32_s25 = int_to_ptr.vmem [resolvable:$true] %s31_s25 }
   0x5   :  { %s508_s26 = scalar_lea.vmem %s32_s25, 128  ;;  %p513_p1 = scmp.lt.s32.totalorder %s32_s25, %s32_s25 }
   0x6   :  { %p509_p0 = scmp.ne.s32.totalorder %s32_s25, %s508_s26  ;;  %p514_p2 = scmp.lt.s32.totalorder %s508_s26, %s508_s26 }
   0x8   :  { %p515_p3 = por %p514_p2, %p513_p1 }
   0xa   :  { %p516_p4 = pnand %p515_p3, %p509_p0 }
   0xc   :  { %519 = shalt.err (!%p516_p4)
}
   0xd   :  { %s609_s27 = smov 64   ;;  %s610_s28 = smov 4  }
   0xe   :  { %37 = dma.hbm_to_vmem [thread:$0]  %s711_s1, 128, %s32_s25, [#allocation6], %s609_s27, %s609_s27, %s610_s28  }
   0xf   :  { %s611_s8 = smov [#allocation2]   ;;  %s612_s10 = smov [#allocation7]  }
  0x10   :  { %s22_s9 = sshll.u32 %s611_s8, 4  ;;  %s45_s11 = sshll.u32 %s612_s10, 4  ;;  %s23_s9 = int_to_ptr.vmem [resolvable:$true] %s22_s9  ;;  %s46_s11 = int_to_ptr.vmem [resolvable:$true] %s45_s11 }
  0x11   :  { %s528_s12 = scalar_lea.vmem %s23_s9, 128  ;;  %p533_p6 = scmp.lt.s32.totalorder %s23_s9, %s23_s9 }
  0x12   :  { %p529_p5 = scmp.ne.s32.totalorder %s23_s9, %s528_s12  ;;  %p534_p7 = scmp.lt.s32.totalorder %s528_s12, %s528_s12 }
  0x14   :  { %p535_p8 = por %p534_p7, %p533_p6 }
  0x16   :  { %p536_p9 = pnand %p535_p8, %p529_p5 }
  0x18   :  { %539 = shalt.err (!%p536_p9)
}
  0x19   :  { %25 = dma.hbm_to_vmem [thread:$0]  %s710_s0, 128, %s23_s9, [#allocation3]  }
  0x1a   :  { %s548_s15 = scalar_lea.vmem %s46_s11, 1024  ;;  %p553_p11 = scmp.lt.s32.totalorder %s46_s11, %s46_s11 }
  0x1b   :  { %p549_p10 = scmp.ne.s32.totalorder %s46_s11, %s548_s15  ;;  %p554_p12 = scmp.lt.s32.totalorder %s548_s15, %s548_s15 }
  0x1d   :  { %p555_p13 = por %p554_p12, %p553_p11 }
  0x1f   :  { %p556_p0 = pnand %p555_p13, %p549_p10 }
  0x21   :  { %559 = shalt.err (!%p556_p0)
}
  0x22   :  { %51 = dma.hbm_to_vmem [thread:$0]  %s713_s3, 1024, %s46_s11, [#allocation6], %s609_s27, %s609_s27, %s610_s28  }
  0x23   :  { %s613_s17 = smov [#allocation8]  }
  0x24   :  { %s59_s18 = sshll.u32 %s613_s17, 4  ;;  %s60_s18 = int_to_ptr.vmem [resolvable:$true] %s59_s18 }
  0x25   :  { %s568_s19 = scalar_lea.vmem %s60_s18, 1024  ;;  %p573_p2 = scmp.lt.s32.totalorder %s60_s18, %s60_s18 }
  0x26   :  { %p569_p1 = scmp.ne.s32.totalorder %s60_s18, %s568_s19  ;;  %p574_p3 = scmp.lt.s32.totalorder %s568_s19, %s568_s19 }
  0x28   :  { %p575_p4 = por %p574_p3, %p573_p2 }
  0x2a   :  { %p576_p5 = pnand %p575_p4, %p569_p1 }
  0x2c   :  { %579 = shalt.err (!%p576_p5)
}
  0x2d   :  { %65 = dma.hbm_to_vmem [thread:$0]  %s715_s5, 1024, %s60_s18, [#allocation9], %s609_s27, %s609_s27, %s610_s28  }
  0x2e   :  { %600 = dma.done.wait [#allocation3], 128  }
  0x2f   :  { %601 = vsyncadd [#allocation3], 4294967168 }
  0x30   :  { %602 = dma.done.wait [#allocation6], 1152  }
  0x31   :  { %603 = vsyncadd [#allocation6], 4294966144 }
  0x32   :  { %604 = dma.done.wait [#allocation9], 1024  }
  0x33   :  { %605 = vsyncadd [#allocation9], 4294966272  ;;  %v614_v0 = vmov 0.0   ;;  %vm615_vm0 = vmmov 0   ;;  %v483_v1 = vld [vmem:[#allocation5] sm:$0xff]   ;;  %v81_v2 = vld [vmem:[#allocation2] sm:$0xff] }
  0x34   :  { %428 = vmatprep.subr.bf16.mxu0 %v614_v0  ;;  %430 = vmatprep.mubr.msk.bf16.mxu0 %vm615_vm0, %v614_v0  ;;  %v82_v3 = vpack.c.bf16 %v81_v2, %v81_v2  ;;  %vm98_vm1 = vcmask 130048   ;;  %v484_v4 = vld [vmem:[#allocation7 + $0x38] sm:$0xff]   ;;  %v485_v5 = vld [vmem:[#allocation7 + $0x30] sm:$0xff]   ;;  %v486_v6 = vld [vmem:[#allocation7 + $0x28] sm:$0xff]   ;;  %s616_s24 = smov [#allocation10]   ;;  %vm368_vm2 = vcmask 64512  }
  0x35   :  { %434 = vmatprep.subr.bf16.mxu1 %v614_v0  ;;  %450 = vmatprep.mubr.msk.bf16.mxu1 %vm615_vm0, %v614_v0  ;;  %v487_v7 = vld [vmem:[#allocation7 + $0x20] sm:$0xff]   ;;  %v488_v8 = vld [vmem:[#allocation7 + $0x18] sm:$0xff]   ;;  %v489_v9 = vld [vmem:[#allocation7 + $0x10] sm:$0xff]   ;;  %s376_s25 = sshll.u32 %s616_s24, 4  ;;  %s377_s25 = int_to_ptr.vmem [resolvable:$true] %s376_s25 }
  0x36   :  { %429 = vmatpush3.bf16.msra.mxu0 %v483_v1  ;;  %435 = vmatpush3.bf16.msra.mxu1 %v484_v4  ;;  %v490_v10 = vld [vmem:[#allocation7 + $0x8] sm:$0xff]   ;;  %v491_v11 = vld [vmem:[#allocation7] sm:$0xff]   ;;  %v492_v12 = vld [vmem:[#allocation8 + $0x38] sm:$0xff]   ;;  %p585_p7 = scmp.lt.s32.totalorder %s377_s25, %s377_s25 }
  0x37   :  { %454 = vmatprep.subr.bf16.mxu0 %v614_v0  ;;  %436 = vmatprep.subr.bf16.mxu1 %v614_v0  ;;  %v493_v13 = vld [vmem:[#allocation8 + $0x30] sm:$0xff]   ;;  %v494_v14 = vld [vmem:[#allocation8 + $0x28] sm:$0xff]   ;;  %v495_v15 = vld [vmem:[#allocation8 + $0x20] sm:$0xff]  }
  0x38   :  { %v496_v16 = vld [vmem:[#allocation8 + $0x18] sm:$0xff]   ;;  %v497_v17 = vld [vmem:[#allocation8 + $0x10] sm:$0xff]   ;;  %v498_v26 = vld [vmem:[#allocation8 + $0x8] sm:$0xff]  }
  0x39   :  { %431 = vmatmul.mubr.msk.bf16.vlgmr.msra.gmra.mxu0 %vm98_vm1, %v82_v3  ;;  %v387_v18 = vld [vmem:[%s712_s2] ss:$0 sm:$0xff]  ;;  %v499_v27 = vld [vmem:[#allocation8] sm:$0xff]  }
  0x3a   :  { %470 = vmatprep.mubr.msk.bf16.mxu0 %vm615_vm0, %v614_v0  ;;  %437 = vmatpush3.bf16.msra.mxu1 %v485_v5  ;;  %v390_v28 = vld [vmem:[%s714_s4] ss:$0 sm:$0xff]  ;;  %s580_s4 = scalar_lea.vmem %s377_s25, 128 }
  0x3b   :  { %438 = vmatprep.subr.bf16.mxu1 %v614_v0  ;;  %455 = vmatpush3.bf16.msra.mxu0 %v492_v12  ;;  %v399_v36 = vld [vmem:[%s716_s6] ss:$0 sm:$0xff]  ;;  %p581_p6 = scmp.ne.s32.totalorder %s377_s25, %s580_s4  ;;  %p586_p8 = scmp.lt.s32.totalorder %s580_s4, %s580_s4 }
  0x3c   :  { %456 = vmatprep.subr.bf16.mxu0 %v614_v0 }
  0x3d   :  { %p587_p9 = por %p586_p8, %p585_p7 }
  0x3e   :  { %439 = vmatpush3.bf16.msra.mxu1 %v486_v6 }
  0x3f   :  { %440 = vmatprep.subr.bf16.mxu1 %v614_v0  ;;  %457 = vmatpush3.bf16.msra.mxu0 %v493_v13  ;;  %p588_p10 = pnand %p587_p9, %p581_p6 }
  0x40   :  { %458 = vmatprep.subr.bf16.mxu0 %v614_v0 }
  0x42   :  { %441 = vmatpush3.bf16.msra.mxu1 %v487_v7 }
  0x43   :  { %442 = vmatprep.subr.bf16.mxu1 %v614_v0  ;;  %459 = vmatpush3.bf16.msra.mxu0 %v494_v14 }
  0x44   :  { %460 = vmatprep.subr.bf16.mxu0 %v614_v0 }
  0x46   :  { %443 = vmatpush3.bf16.msra.mxu1 %v488_v8 }
  0x47   :  { %444 = vmatprep.subr.bf16.mxu1 %v614_v0  ;;  %461 = vmatpush3.bf16.msra.mxu0 %v495_v15 }
  0x48   :  { %462 = vmatprep.subr.bf16.mxu0 %v614_v0 }
  0x4a   :  { %445 = vmatpush3.bf16.msra.mxu1 %v489_v9 }
  0x4b   :  { %446 = vmatprep.subr.bf16.mxu1 %v614_v0  ;;  %463 = vmatpush3.bf16.msra.mxu0 %v496_v16 }
  0x4c   :  { %464 = vmatprep.subr.bf16.mxu0 %v614_v0 }
  0x4e   :  { %447 = vmatpush3.bf16.msra.mxu1 %v490_v10 }
  0x4f   :  { %448 = vmatprep.subr.bf16.mxu1 %v614_v0  ;;  %465 = vmatpush3.bf16.msra.mxu0 %v497_v17 }
  0x50   :  { %466 = vmatprep.subr.bf16.mxu0 %v614_v0 }
  0x52   :  { %449 = vmatpush3.bf16.msra.mxu1 %v491_v11 }
  0x53   :  { %467 = vmatpush3.bf16.msra.mxu0 %v498_v26 }
  0x54   :  { %468 = vmatprep.subr.bf16.mxu0 %v614_v0 }
  0x57   :  { %469 = vmatpush3.bf16.msra.mxu0 %v499_v27 }
  0xf9   :  { %v136_v19 = vpop.f32.mrf.mxu0 }
  0xfa   :  { %v137_v20 = vadd.f32 %v387_v18, %v136_v19 }
  0xfb   :  { %v432_v21 = vpop.f32.mrf.mxu0 }
  0xfc   :  { %v142_v22 = vmax.f32 %v137_v20, 0.0 }
  0xfd   :  { %v139_v23 = vpop.f32.mrf.mxu0 }
  0xfe   :  { %v143_v24 = vpack.c.bf16 %v142_v22, %v142_v22 }
  0xff   :  { %v433_v25 = vpop.f32.mrf.mxu0 }
 0x100   :  { %451 = vmatmul.mubr.bf16.vlgmr.msra.gmra.mxu1 %v143_v24 }
 0x1c0   :  { %v249_v29 = vpop.f32.mrf.mxu1 }
 0x1c1   :  { %v250_v30 = vadd.f32 %v390_v28, %v249_v29 }
 0x1c2   :  { %v452_v31 = vpop.f32.mrf.mxu1 }
 0x1c3   :  { %v255_v32 = vmax.f32 %v250_v30, 0.0 }
 0x1c4   :  { %v252_v33 = vpop.f32.mrf.mxu1 }
 0x1c5   :  { %v256_v34 = vpack.c.bf16 %v255_v32, %v255_v32 }
 0x1c6   :  { %v453_v35 = vpop.f32.mrf.mxu1 }
 0x1c7   :  { %471 = vmatmul.mubr.bf16.vlgmr.msra.gmra.mxu0 %v256_v34 }
 0x287   :  { %v362_v37 = vpop.f32.mrf.mxu0 }
 0x288   :  { %v363_v38 = vadd.f32 %v399_v36, %v362_v37 }
 0x289   :  { %v472_v39 = vpop.f32.mrf.mxu0 }
 0x28a   :  { %369 = vst.msk [vmem:[#allocation10] sm:$0xff] %vm368_vm2, %v363_v38 }
 0x28b   :  { %v365_v40 = vpop.f32.mrf.mxu0 }
 0x28c   :  { %591 = shalt.err (!%p588_p10)
}
 0x28d   :  { %379 = dma.vmem_to_hbm [thread:$0]  %s377_s25, 128, %s717_s7, [#allocation4]   ;;  %v473_v41 = vpop.f32.mrf.mxu0 }
 0x28e   :  { %606 = dma.done.wait [#allocation4], 128  }
 0x28f   :  { %607 = vsyncadd [#allocation4], 4294967168 }
 0x290   :  { %383 = vsyncpa [#allocation3], 1 }
 0x291   :  { %384 = vsyncpa [#allocation6], 1 }
 0x292   :  { %385 = vsyncpa [#allocation9], 1 }
 0x293   :  { %386 = vsyncpa [#allocation4], 1 }

</bundles_post_ra>
